<compile_context>
chip_gen: v7x
topology: tpu7x:2x2x1
jax: 0.10.0
libtpu: 0.0.40
codegen_flags: <defaults>
</compile_context>

<pallas_src>
import jax
import jax.numpy as jnp
from jax.experimental import pallas as pl
from jax.experimental.pallas import tpu as pltpu

LANE = 128
NEG_BIG = -1e30  # fills padded logit lanes' bias; never wins the softmax max


def _round_up(n, m):
    return ((n + m - 1) // m) * m


# ----------------------------------------------------------------------------
# Parameter packing: fuse i2h/i2o and pad all feature axes to lane multiples.
# ----------------------------------------------------------------------------
def pack_params(w_i2h, b_i2h, w_i2o, b_i2o, input_size, dtype=jnp.float32):
    """w_i2h:(I+H,H)  b_i2h:(1,H)  w_i2o:(I+H,O)  b_i2o:(1,O)  (in,out layout).

    Returns
      w_pad: (I_pad + H_pad, H_pad + O_pad)   fused, lane-padded weight
      b_pad: (1, H_pad + O_pad)               fused bias; padded logit lanes
                                              hold -1e30 so softmax ignores them
    """
    in_feat, H = w_i2h.shape
    O = w_i2o.shape[1]
    I = input_size
    assert in_feat == I + H
    Ip, Hp, Op = _round_up(I, LANE), _round_up(H, LANE), _round_up(O, LANE)

    w = jnp.zeros((Ip + Hp, Hp + Op), jnp.float32)
    # input rows
    w = w.at[:I, :H].set(w_i2h[:I])
    w = w.at[:I, Hp:Hp + O].set(w_i2o[:I])
    # hidden rows
    w = w.at[Ip:Ip + H, :H].set(w_i2h[I:])
    w = w.at[Ip:Ip + H, Hp:Hp + O].set(w_i2o[I:])

    b = jnp.zeros((1, Hp + Op), jnp.float32)
    b = b.at[:, :H].set(b_i2h)
    b = b.at[:, Hp:Hp + O].set(b_i2o)
    b = b.at[:, Hp + O:].set(NEG_BIG)
    return w.astype(dtype), b.astype(dtype)


# ----------------------------------------------------------------------------
# Kernel: one batch-block x one time-chunk per grid step; Tc steps unrolled.
# ----------------------------------------------------------------------------
def rnn_seq_kernel(x_ref, h0_ref, w_ref, b_ref, out_ref, hid_ref, comb_scr):
    """x_ref:(Tc,Bb,Ip)  h0_ref:(Bb,Hp)  w_ref:(Ip+Hp,Hp+Op)  b_ref:(1,Hp+Op)
    out_ref:(Tc,Bb,Op)  hid_ref:(Bb,Hp)  comb_scr:(Bb,Ip+Hp) persistent VMEM."""
    ci = pl.program_id(1)                      # time-chunk index (recurrence)
    Tc = x_ref.shape[0]
    Bb = x_ref.shape[1]
    Ip = x_ref.shape[2]
    Hp = h0_ref.shape[1]
    Np = w_ref.shape[1]

    # Initialize the hidden half of the combined slab at the first chunk of
    # every batch block; the x half is fully overwritten before first use.
    @pl.when(ci == 0)
    def _():
        comb_scr[:, Ip:] = h0_ref[...].astype(comb_scr.dtype)

    # Hoisted out of the unrolled loop (JAX does not CSE broadcast_in_dim).
    bias = jnp.broadcast_to(b_ref[...].astype(jnp.float32), (Bb, Np))

    for t in range(Tc):                        # fully unrolled static loop
        comb_scr[:, :Ip] = x_ref[t]            # aligned 128-lane write
        acc = jnp.dot(comb_scr[...], w_ref[...],
                      preferred_element_type=jnp.float32) + bias
        new_h = acc[:, :Hp]                    # aligned whole-vreg split
        logits = acc[:, Hp:]                   # padded lanes ~ -1e30
        m = jnp.max(logits, axis=-1, keepdims=True)
        z = logits - m
        lse = jnp.log(jnp.sum(jnp.exp(z), axis=-1, keepdims=True))
        out_ref[t] = (z - lse).astype(out_ref.dtype)   # lane-dense VMEM store
        comb_scr[:, Ip:] = new_h.astype(comb_scr.dtype)  # carry stays in VMEM

    # Only the last chunk needs to materialize the final hidden state.
    @pl.when(ci == pl.num_programs(1) - 1)
    def _():
        hid_ref[...] = comb_scr[:, Ip:].astype(hid_ref.dtype)


# ----------------------------------------------------------------------------
# Wrappers
# ----------------------------------------------------------------------------
def rnn_sequence(x_seq, h0, w_pad, b_pad, output_size, *, t_chunk=8, b_block=None):
    """Run T recurrence steps in one pallas_call.

    x_seq: (T, B, I) ; h0: (B, H) ; w_pad/b_pad from pack_params.
    Returns (log_softmax outputs (T, B, O), final hidden (B, H))."""
    T, B, I = x_seq.shape
    H = h0.shape[-1]
    Kp, Np = w_pad.shape
    Ip, Hp = _round_up(I, LANE), _round_up(H, LANE)
    Op = Np - Hp
    assert Kp == Ip + Hp
    O = output_size
    cdt = w_pad.dtype                          # compute / operand dtype

    Tc = min(t_chunk, T)
    assert T % Tc == 0, "T must be divisible by the time-chunk size"
    Bb = B if b_block is None else b_block
    assert B % Bb == 0 and (Bb == B or Bb % 8 == 0)

    # Pad feature axes to lane multiples; zero x-pads hit zero weight rows.
    x_p = jnp.zeros((T, B, Ip), cdt).at[:, :, :I].set(x_seq.astype(cdt))
    h0_p = jnp.zeros((B, Hp), cdt).at[:, :H].set(h0.astype(cdt))

    grid = (B // Bb, T // Tc)                  # (parallel batch, serial time)
    itemsize = jnp.dtype(cdt).itemsize
    cost = pl.CostEstimate(
        flops=int(2 * T * B * Kp * Np),
        transcendentals=int(T * B * Op),
        bytes_accessed=int(x_p.nbytes + h0_p.nbytes + w_pad.nbytes + b_pad.nbytes
                           + T * B * Op * itemsize + B * Hp * h0.dtype.itemsize))

    # TODO(synk): for real workloads feed B >= 128 independent sequences per
    # block (and re-derive Tc / vmem_limit_bytes for v7x's 64 MiB VMEM); at the
    # demo shapes everything fits comfortably in the default scoped VMEM.
    out_p, hid_p = pl.pallas_call(
        rnn_seq_kernel,
        grid=grid,
        in_specs=[
            pl.BlockSpec((Tc, Bb, Ip), lambda b, c: (c, b, 0)),  # x chunk
            pl.BlockSpec((Bb, Hp), lambda b, c: (b, 0)),         # h0 (resident)
            pl.BlockSpec((Kp, Np), lambda b, c: (0, 0)),         # fused weight
            pl.BlockSpec((1, Np), lambda b, c: (0, 0)),          # fused bias
        ],
        out_specs=[
            pl.BlockSpec((Tc, Bb, Op), lambda b, c: (c, b, 0)),  # chunked outs
            pl.BlockSpec((Bb, Hp), lambda b, c: (b, 0)),         # final hidden
        ],
        out_shape=[jax.ShapeDtypeStruct((T, B, Op), cdt),
                   jax.ShapeDtypeStruct((B, Hp), h0.dtype)],
        scratch_shapes=[pltpu.VMEM((Bb, Kp), cdt)],              # combined slab
        compiler_params=pltpu.CompilerParams(
            dimension_semantics=("parallel", "arbitrary")),
        cost_estimate=cost,
    )(x_p, h0_p, w_pad, b_pad)

    return out_p[:, :, :O], hid_p[:, :H]


def rnn_step(x, h, w_pad, b_pad, output_size):
    """Exact equivalent of the module's forward(): one step."""
    out_seq, h_new = rnn_sequence(x[None], h, w_pad, b_pad, output_size)
    return out_seq[0], h_new


# ----------------------------------------------------------------------------
# Demo / correctness check
# ----------------------------------------------------------------------------
if __name__ == "__main__":
    batch = 8
    input_size = 16
    hidden_size = 32
    output_size = 8
    seq_len = 8

    key = jax.random.PRNGKey(0)
    k_x, k_wh, k_bh, k_wo, k_bo = jax.random.split(key, 5)

    in_feat = input_size + hidden_size
    bound = 1.0 / float(in_feat) ** 0.5
    # Transposed-PyTorch layout: (in_features, out_features).
    w_i2h = jax.random.uniform(k_wh, (in_feat, hidden_size),
                               minval=-bound, maxval=bound, dtype=jnp.float32)
    b_i2h = jax.random.uniform(k_bh, (1, hidden_size),
                               minval=-bound, maxval=bound, dtype=jnp.float32)
    w_i2o = jax.random.uniform(k_wo, (in_feat, output_size),
                               minval=-bound, maxval=bound, dtype=jnp.float32)
    b_i2o = jax.random.uniform(k_bo, (1, output_size),
                               minval=-bound, maxval=bound, dtype=jnp.float32)

    x_seq = jax.random.normal(k_x, (seq_len, batch, input_size), dtype=jnp.float32)
    h0 = jnp.zeros((batch, hidden_size), dtype=jnp.float32)   # like init_hidden()

    # Pure-JAX reference (exact PyTorch forward semantics, scanned over time).
    def ref_step(h, x_t):
        c = jnp.concatenate([x_t, h], axis=1)
        h_new = c @ w_i2h + b_i2h
        o = jax.nn.log_softmax(c @ w_i2o + b_i2o, axis=1)
        return h_new, o

    ref_hT, ref_outs = jax.lax.scan(ref_step, h0, x_seq)

    # ---- f32 operands: strict check ----
    w_pad, b_pad = pack_params(w_i2h, b_i2h, w_i2o, b_i2o, input_size,
                               dtype=jnp.float32)

    out1, h1 = rnn_step(x_seq[0], h0, w_pad, b_pad, output_size)
    jax.block_until_ready((out1, h1))
    assert jnp.allclose(out1, ref_outs[0], atol=2e-3, rtol=2e-3)
    assert jnp.allclose(h1, ref_outs.shape and (jnp.concatenate([x_seq[0], h0], 1) @ w_i2h + b_i2h),
                        atol=2e-3, rtol=2e-3)

    out_seq, h_final = rnn_sequence(x_seq, h0, w_pad, b_pad, output_size)
    jax.block_until_ready((out_seq, h_final))
    assert jnp.allclose(out_seq, ref_outs, atol=2e-3, rtol=2e-3)
    assert jnp.allclose(h_final, ref_hT, atol=2e-3, rtol=2e-3)

    # Multi-chunk run (t_chunk=2 -> grid (1,4)): exercises cross-chunk carry.
    out_seq_c, h_final_c = rnn_sequence(x_seq, h0, w_pad, b_pad, output_size,
                                        t_chunk=2)
    jax.block_until_ready((out_seq_c, h_final_c))
    assert jnp.allclose(out_seq_c, ref_outs, atol=2e-3, rtol=2e-3)
    assert jnp.allclose(h_final_c, ref_hT, atol=2e-3, rtol=2e-3)

    # ---- bf16 operands (v6e/v7x MXU-native), f32 accumulation: loose check ----
    w_bf, b_bf = pack_params(w_i2h, b_i2h, w_i2o, b_i2o, input_size,
                             dtype=jnp.bfloat16)
    out_bf, h_bf = rnn_sequence(x_seq, h0, w_bf, b_bf, output_size)
    jax.block_until_ready((out_bf, h_bf))
    assert jnp.allclose(out_bf.astype(jnp.float32), ref_outs, atol=1e-1, rtol=1e-1)
    assert jnp.allclose(h_bf, ref_hT, atol=1e-1, rtol=1e-1)

    print("KERNEL_OK")
</pallas_src>

<mosaic_0001>
module attributes {stable_mosaic.version = 11 : i64} {
  func.func @rnn_seq_kernel(%arg0: i32, %arg1: i32, %arg2: memref<1x8x128xf32, #tpu.memory_space<vmem>>, %arg3: memref<8x128xf32, #tpu.memory_space<vmem>>, %arg4: memref<256x256xf32, #tpu.memory_space<vmem>>, %arg5: memref<1x256xf32, #tpu.memory_space<vmem>>, %arg6: memref<1x8x128xf32, #tpu.memory_space<vmem>>, %arg7: memref<8x128xf32, #tpu.memory_space<vmem>>, %arg8: memref<8x256xf32, #tpu.memory_space<vmem>>) attributes {dimension_semantics = [#tpu.dimension_semantics<parallel>, #tpu.dimension_semantics<arbitrary>], iteration_bounds = array<i64: 1, 1>, scalar_prefetch = 0 : i64, scratch_operands = 1 : i64, tpu.core_type = #tpu.core_type<tc>, window_params = [{transform_indices = @transform_0, window_bounds = array<i64: 1, 8, 128>}, {transform_indices = @transform_1, window_bounds = array<i64: 8, 128>}, {pipeline_mode = #tpu.pipeline_mode<synchronous>, transform_indices = @transform_2, window_bounds = array<i64: 256, 256>}, {pipeline_mode = #tpu.pipeline_mode<synchronous>, transform_indices = @transform_3, window_bounds = array<i64: 1, 256>}, {transform_indices = @transform_4, window_bounds = array<i64: 1, 8, 128>}, {transform_indices = @transform_5, window_bounds = array<i64: 8, 128>}]} {
    %c0_i32 = arith.constant 0 : i32
    %0 = arith.cmpi eq, %arg1, %c0_i32 : i32
    %1 = arith.extui %0 : i1 to i32
    %c0_i32_0 = arith.constant 0 : i32
    %2 = arith.cmpi ne, %1, %c0_i32_0 : i32
    scf.if %2 {
      %c0_19 = arith.constant 0 : index
      %c0_20 = arith.constant 0 : index
      %32 = vector.load %arg3[%c0_19, %c0_20] : memref<8x128xf32, #tpu.memory_space<vmem>>, vector<8x128xf32>
      %c0_21 = arith.constant 0 : index
      %c128_22 = arith.constant 128 : index
      %33 = vector.load %arg8[%c0_21, %c128_22] : memref<8x256xf32, #tpu.memory_space<vmem>>, vector<8x128xf32>
      tpu.vector_store %arg8[%c0_21, %c128_22], %32 {strides = array<i32>} : memref<8x256xf32, #tpu.memory_space<vmem>>, vector<8x128xf32>,
    } else {
    }
    %c0 = arith.constant 0 : index
    %c0_1 = arith.constant 0 : index
    %3 = vector.load %arg5[%c0, %c0_1] : memref<1x256xf32, #tpu.memory_space<vmem>>, vector<1x256xf32>
    %4 = vector.shape_cast %3 : vector<1x256xf32> to vector<1x256xf32>
    %5 = vector.broadcast %4 : vector<1x256xf32> to vector<8x256xf32>
    %c0_2 = arith.constant 0 : index
    %c0_3 = arith.constant 0 : index
    %c0_4 = arith.constant 0 : index
    %6 = vector.load %arg2[%c0_2, %c0_3, %c0_4] : memref<1x8x128xf32, #tpu.memory_space<vmem>>, vector<1x8x128xf32>
    %7 = vector.shape_cast %6 : vector<1x8x128xf32> to vector<8x128xf32>
    %c0_5 = arith.constant 0 : index
    %c0_6 = arith.constant 0 : index
    %8 = vector.load %arg8[%c0_5, %c0_6] : memref<8x256xf32, #tpu.memory_space<vmem>>, vector<8x128xf32>
    tpu.vector_store %arg8[%c0_5, %c0_6], %7 {strides = array<i32>} : memref<8x256xf32, #tpu.memory_space<vmem>>, vector<8x128xf32>,
    %c0_7 = arith.constant 0 : index
    %c0_8 = arith.constant 0 : index
    %9 = vector.load %arg8[%c0_7, %c0_8] : memref<8x256xf32, #tpu.memory_space<vmem>>, vector<8x256xf32>
    %c0_9 = arith.constant 0 : index
    %c0_10 = arith.constant 0 : index
    %10 = vector.load %arg4[%c0_9, %c0_10] : memref<256x256xf32, #tpu.memory_space<vmem>>, vector<256x256xf32>
    %cst = arith.constant dense<0.000000e+00> : vector<8x256xf32>
    %11 = tpu.matmul %9, %10, %cst {dimension_numbers = #tpu.dot_dimension_numbers<[1], [0], [0], [1], [0, 0, 1, 1], [], []>} : vector<8x256xf32>, vector<256x256xf32>, vector<8x256xf32> -> vector<8x256xf32>
    %12 = arith.addf %11, %5 : vector<8x256xf32>
    %13 = vector.extract_strided_slice %12 {offsets = [0, 0], sizes = [8, 128], strides = [1, 1]} : vector<8x256xf32> to vector<8x128xf32>
    %14 = vector.extract_strided_slice %12 {offsets = [0, 128], sizes = [8, 128], strides = [1, 1]} : vector<8x256xf32> to vector<8x128xf32>
    %cst_11 = arith.constant dense<0xFF800000> : vector<8xf32>
    %15 = vector.multi_reduction <maximumf>, %14, %cst_11 [1] : vector<8x128xf32> to vector<8xf32>
    %16 = vector.shape_cast %15 : vector<8xf32> to vector<8x1xf32>
    %17 = vector.broadcast %16 : vector<8x1xf32> to vector<8x128xf32>
    %18 = arith.subf %14, %17 : vector<8x128xf32>
    %19 = math.exp %18 : vector<8x128xf32>
    %cst_12 = arith.constant dense<0.000000e+00> : vector<8xf32>
    %20 = vector.multi_reduction <add>, %19, %cst_12 [1] : vector<8x128xf32> to vector<8xf32>
    %21 = vector.shape_cast %20 : vector<8xf32> to vector<8x1xf32>
    %22 = math.log %21 : vector<8x1xf32>
    %23 = vector.broadcast %22 : vector<8x1xf32> to vector<8x128xf32>
    %24 = arith.subf %18, %23 : vector<8x128xf32>
    %c0_13 = arith.constant 0 : index
    %c0_14 = arith.constant 0 : index
    %c0_15 = arith.constant 0 : index
    %25 = vector.load %arg6[%c0_13, %c0_14, %c0_15] : memref<1x8x128xf32, #tpu.memory_space<vmem>>, vector<1x8x128xf32>
    %26 = vector.shape_cast %25 : vector<1x8x128xf32> to vector<8x128xf32>
    %27 = vector.shape_cast %24 : vector<8x128xf32> to vector<1x8x128xf32>
    tpu.vector_store %arg6[%c0_13, %c0_14, %c0_15], %27 {strides = array<i32>} : memref<1x8x128xf32, #tpu.memory_space<vmem>>, vector<1x8x128xf32>,
    %c0_16 = arith.constant 0 : index
    %c128 = arith.constant 128 : index
    %28 = vector.load %arg8[%c0_16, %c128] : memref<8x256xf32, #tpu.memory_space<vmem>>, vector<8x128xf32>
    tpu.vector_store %arg8[%c0_16, %c128], %13 {strides = array<i32>} : memref<8x256xf32, #tpu.memory_space<vmem>>, vector<8x128xf32>,
    %c0_i32_17 = arith.constant 0 : i32
    %29 = arith.cmpi eq, %arg1, %c0_i32_17 : i32
    %30 = arith.extui %29 : i1 to i32
    %c0_i32_18 = arith.constant 0 : i32
    %31 = arith.cmpi ne, %30, %c0_i32_18 : i32
    scf.if %31 {
      %c0_19 = arith.constant 0 : index
      %c128_20 = arith.constant 128 : index
      %32 = vector.load %arg8[%c0_19, %c128_20] : memref<8x256xf32, #tpu.memory_space<vmem>>, vector<8x128xf32>
      %c0_21 = arith.constant 0 : index
      %c0_22 = arith.constant 0 : index
      %33 = vector.load %arg7[%c0_21, %c0_22] : memref<8x128xf32, #tpu.memory_space<vmem>>, vector<8x128xf32>
      tpu.vector_store %arg7[%c0_21, %c0_22], %32 {strides = array<i32>} : memref<8x128xf32, #tpu.memory_space<vmem>>, vector<8x128xf32>,
    } else {
    }
    return
  }
  func.func @transform_0(%arg0: i32, %arg1: i32) -> (i32, i32, i32) {
    %c0_i32 = arith.constant 0 : i32
    %c0_i32_0 = arith.constant 0 : i32
    return %arg1, %arg0, %c0_i32 : i32, i32, i32
  }
  func.func @transform_1(%arg0: i32, %arg1: i32) -> (i32, i32) {
    %c0_i32 = arith.constant 0 : i32
    %c0_i32_0 = arith.constant 0 : i32
    return %arg0, %c0_i32 : i32, i32
  }
  func.func @transform_2(%arg0: i32, %arg1: i32) -> (i32, i32) {
    %c0_i32 = arith.constant 0 : i32
    %c0_i32_0 = arith.constant 0 : i32
    %c0_i32_1 = arith.constant 0 : i32
    return %c0_i32, %c0_i32_0 : i32, i32
  }
  func.func @transform_3(%arg0: i32, %arg1: i32) -> (i32, i32) {
    %c0_i32 = arith.constant 0 : i32
    %c0_i32_0 = arith.constant 0 : i32
    %c0_i32_1 = arith.constant 0 : i32
    return %c0_i32, %c0_i32_0 : i32, i32
  }
  func.func @transform_4(%arg0: i32, %arg1: i32) -> (i32, i32, i32) {
    %c0_i32 = arith.constant 0 : i32
    %c0_i32_0 = arith.constant 0 : i32
    return %arg1, %arg0, %c0_i32 : i32, i32, i32
  }
  func.func @transform_5(%arg0: i32, %arg1: i32) -> (i32, i32) {
    %c0_i32 = arith.constant 0 : i32
    %c0_i32_0 = arith.constant 0 : i32
    return %arg0, %c0_i32 : i32, i32
  }
}

</mosaic_0001>

<bundles_post_ra>
// kernel: tpu_custom_call.1
= control target key start
LH: loop header
LB: loop body
LE: loop exit
PB: predicated region body
PF: predicated region fallthrough
CT: control target
= control target key end

     0   :  { %11 = vsyncpa [#allocation4], 0  ;;  %s555_s0 = inlined_call_operand.hbm [shape: f32[1,8,128], index: 0, kind: input, shape index: {}]   ;;  %s556_s1 = inlined_call_operand.hbm [shape: f32[8,128], index: 1, kind: input, shape index: {}]   ;;  %s557_s2 = inlined_call_operand.hbm [shape: f32[256,256], index: 2, kind: input, shape index: {}]   ;;  %s558_s3 = inlined_call_operand.vmem [shape: f32[1,256], index: 3, kind: input, shape index: {}]   ;;  %s559_s4 = inlined_call_operand.hbm [shape: f32[1,8,128], index: 4, kind: output, shape index: {0}]   ;;  %s560_s5 = inlined_call_operand.hbm [shape: f32[8,128], index: 5, kind: output, shape index: {1}]  }
   0x1   :  { %12 = vsyncpa [#allocation7], 0 }
   0x2   :  { %13 = vsyncpa [#allocation5], 0 }
   0x3   :  { %14 = vsyncpa [#allocation11], 0  ;;  %s455_s18 = smov [#allocation6]   ;;  %s456_s20 = smov [#allocation3]  }
   0x4   :  { %s31_s19 = sshll.u32 %s455_s18, 4  ;;  %s21_s21 = sshll.u32 %s456_s20, 4  ;;  %s32_s19 = int_to_ptr.vmem [resolvable:$true] %s31_s19  ;;  %s22_s21 = int_to_ptr.vmem [resolvable:$true] %s21_s21 }
   0x5   :  { %s337_s24 = scalar_lea.hbm %s556_s1, 128 }
   0x6   :  { %p338_p0 = scmp.ne.s32.totalorder %s556_s1, %s337_s24  ;;  %p341_p1 = scmp.lt.u32.totalorder %s337_s24, %s556_s1 }
   0x8   :  { %p343_p2 = pnand %p341_p1, %p338_p0 }
   0xa   :  { %346 = shalt.err (!%p343_p2)
}
   0xb   :  { %s347_s29 = scalar_lea.vmem %s32_s19, 128  ;;  %p352_p4 = scmp.lt.s32.totalorder %s32_s19, %s32_s19 }
   0xc   :  { %p348_p3 = scmp.ne.s32.totalorder %s32_s19, %s347_s29  ;;  %p353_p5 = scmp.lt.s32.totalorder %s347_s29, %s347_s29 }
   0xe   :  { %p354_p6 = por %p353_p5, %p352_p4 }
  0x10   :  { %p355_p7 = pnand %p354_p6, %p348_p3 }
  0x12   :  { %358 = shalt.err (!%p355_p7)
}
  0x13   :  { %34 = dma.hbm_to_vmem [thread:$0]  %s556_s1, 128, %s32_s19, [#allocation7]  }
  0x14   :  { %s359_s9 = scalar_lea.hbm %s555_s0, 128 }
  0x15   :  { %p360_p8 = scmp.ne.s32.totalorder %s555_s0, %s359_s9  ;;  %p363_p9 = scmp.lt.u32.totalorder %s359_s9, %s555_s0 }
  0x17   :  { %p365_p10 = pnand %p363_p9, %p360_p8 }
  0x19   :  { %368 = shalt.err (!%p365_p10)
}
  0x1a   :  { %s369_s14 = scalar_lea.vmem %s22_s21, 128  ;;  %p374_p12 = scmp.lt.s32.totalorder %s22_s21, %s22_s21 }
  0x1b   :  { %p370_p11 = scmp.ne.s32.totalorder %s22_s21, %s369_s14  ;;  %p375_p13 = scmp.lt.s32.totalorder %s369_s14, %s369_s14 }
  0x1d   :  { %p376_p0 = por %p375_p13, %p374_p12 }
  0x1f   :  { %p377_p1 = pnand %p376_p0, %p370_p11 }
  0x21   :  { %380 = shalt.err (!%p377_p1)
}
  0x22   :  { %24 = dma.hbm_to_vmem [thread:$0]  %s555_s0, 128, %s22_s21, [#allocation4]  }
  0x23   :  { %s457_s16 = smov [#allocation8]   ;;  %s381_s20 = scalar_lea.hbm %s557_s2, 8192 }
  0x24   :  { %s40_s17 = sshll.u32 %s457_s16, 4  ;;  %p382_p2 = scmp.ne.s32.totalorder %s557_s2, %s381_s20  ;;  %s41_s17 = int_to_ptr.vmem [resolvable:$true] %s40_s17 }
  0x25   :  { %p385_p3 = scmp.lt.u32.totalorder %s381_s20, %s557_s2 }
  0x27   :  { %p387_p4 = pnand %p385_p3, %p382_p2 }
  0x29   :  { %390 = shalt.err (!%p387_p4)
}
  0x2a   :  { %s391_s26 = scalar_lea.vmem %s41_s17, 8192  ;;  %p396_p6 = scmp.lt.s32.totalorder %s41_s17, %s41_s17 }
  0x2b   :  { %p392_p5 = scmp.ne.s32.totalorder %s41_s17, %s391_s26  ;;  %p397_p7 = scmp.lt.s32.totalorder %s391_s26, %s391_s26 }
  0x2d   :  { %p398_p8 = por %p397_p7, %p396_p6 }
  0x2f   :  { %p399_p9 = pnand %p398_p8, %p392_p5 }
  0x31   :  { %402 = shalt.err (!%p399_p9)
}
  0x32   :  { %s458_s0 = smov 256   ;;  %s459_s21 = smov 16  }
  0x33   :  { %46 = dma.hbm_to_vmem [thread:$0]  %s557_s2, 8192, %s41_s17, [#allocation7], %s458_s0, %s458_s0, %s459_s21  }
  0x34   :  { %447 = dma.done.wait [#allocation4], 128  }
  0x35   :  { %448 = vsyncadd [#allocation4], 4294967168 }
  0x36   :  { %449 = dma.done.wait [#allocation7], 8320  }
  0x37   :  { %450 = vsyncadd [#allocation7], 4294958976  ;;  %v81_v0 = vld [vmem:[#allocation8 + $0x8] sm:$0xff]  ;;  %v83_v1 = vld [vmem:[#allocation8 + $0x18] sm:$0xff]  ;;  %s460_s30 = smov [#allocation10]  }
  0x38   :  { %v80_v2 = vld [vmem:[#allocation8] sm:$0xff]  ;;  %v262_v3 = vpack.c.bf16 %v83_v1, %v81_v0  ;;  %v82_v4 = vld [vmem:[#allocation8 + $0x10] sm:$0xff]  ;;  %v85_v5 = vld [vmem:[#allocation8 + $0x28] sm:$0xff]  ;;  %s248_s6 = sshll.u32 %s460_s30, 4  ;;  %s249_s6 = int_to_ptr.vmem [resolvable:$true] %s248_s6 }
  0x39   :  { %v87_v6 = vld [vmem:[#allocation8 + $0x38] sm:$0xff]  ;;  %v264_v7 = vpack.c.bf16 %v82_v4, %v80_v2  ;;  %v84_v9 = vld [vmem:[#allocation8 + $0x20] sm:$0xff]  ;;  %v86_v10 = vld [vmem:[#allocation8 + $0x30] sm:$0xff]  ;;  %s403_s7 = scalar_lea.vmem %s249_s6, 128  ;;  %p408_p11 = scmp.lt.s32.totalorder %s249_s6, %s249_s6 }
  0x3a   :  { %v266_v8 = vpack.c.bf16 %v87_v6, %v85_v5  ;;  %v89_v11 = vld [vmem:[#allocation8 + $0x48] sm:$0xff]  ;;  %263 = vmatprep.subr.bf16.mxu0 %v262_v3  ;;  %v91_v12 = vld [vmem:[#allocation8 + $0x58] sm:$0xff]  ;;  %v268_v13 = vpack.c.bf16 %v86_v10, %v84_v9  ;;  %v88_v15 = vld [vmem:[#allocation8 + $0x40] sm:$0xff]  ;;  %p404_p10 = scmp.ne.s32.totalorder %s249_s6, %s403_s7  ;;  %p409_p12 = scmp.lt.s32.totalorder %s403_s7, %s403_s7 }
  0x3b   :  { %265 = vmatpush1.bf16.msra.mxu0 %v264_v7  ;;  %v270_v14 = vpack.c.bf16 %v91_v12, %v89_v11  ;;  %v90_v16 = vld [vmem:[#allocation8 + $0x50] sm:$0xff]  ;;  %v93_v17 = vld [vmem:[#allocation8 + $0x68] sm:$0xff]  ;;  %v95_v18 = vld [vmem:[#allocation8 + $0x78] sm:$0xff] }
  0x3c   :  { %267 = vmatprep.subr.bf16.mxu0 %v266_v8  ;;  %v272_v19 = vpack.c.bf16 %v90_v16, %v88_v15  ;;  %v274_v20 = vpack.c.bf16 %v95_v18, %v93_v17  ;;  %v92_v21 = vld [vmem:[#allocation8 + $0x60] sm:$0xff]  ;;  %v94_v22 = vld [vmem:[#allocation8 + $0x70] sm:$0xff]  ;;  %v97_v23 = vld [vmem:[#allocation8 + $0x88] sm:$0xff]  ;;  %p410_p13 = por %p409_p12, %p408_p11 }
  0x3d   :  { %v99_v24 = vld [vmem:[#allocation8 + $0x98] sm:$0xff]  ;;  %v276_v25 = vpack.c.bf16 %v94_v22, %v92_v21  ;;  %v96_v27 = vld [vmem:[#allocation8 + $0x80] sm:$0xff]  ;;  %v98_v28 = vld [vmem:[#allocation8 + $0x90] sm:$0xff] }
  0x3e   :  { %v278_v26 = vpack.c.bf16 %v99_v24, %v97_v23  ;;  %v101_v29 = vld [vmem:[#allocation8 + $0xa8] sm:$0xff]  ;;  %v103_v30 = vld [vmem:[#allocation8 + $0xb8] sm:$0xff]  ;;  %v280_v31 = vpack.c.bf16 %v98_v28, %v96_v27  ;;  %v100_v33 = vld [vmem:[#allocation8 + $0xa0] sm:$0xff]  ;;  %p411_p0 = pnand %p410_p13, %p404_p10 }
  0x3f   :  { %269 = vmatpush1.bf16.msra.mxu0 %v268_v13  ;;  %v282_v32 = vpack.c.bf16 %v103_v30, %v101_v29  ;;  %v102_v34 = vld [vmem:[#allocation8 + $0xb0] sm:$0xff]  ;;  %v105_v35 = vld [vmem:[#allocation8 + $0xc8] sm:$0xff]  ;;  %v107_v36 = vld [vmem:[#allocation8 + $0xd8] sm:$0xff] }
  0x40   :  { %271 = vmatprep.subr.bf16.mxu0 %v270_v14  ;;  %v284_v37 = vpack.c.bf16 %v102_v34, %v100_v33  ;;  %v286_v38 = vpack.c.bf16 %v107_v36, %v105_v35  ;;  %v104_v39 = vld [vmem:[#allocation8 + $0xc0] sm:$0xff]  ;;  %v106_v40 = vld [vmem:[#allocation8 + $0xd0] sm:$0xff]  ;;  %v62_v41 = vld [vmem:[#allocation6] sm:$0xff]  ;;  %v66_v34 = vlaneseq }
  0x41   :  { %v109_v42 = vld [vmem:[#allocation8 + $0xe8] sm:$0xff]  ;;  %v111_v43 = vld [vmem:[#allocation8 + $0xf8] sm:$0xff]  ;;  %208 = vmatprep.mubr.f32.mxu0 %v62_v41  ;;  %v288_v44 = vpack.c.bf16 %v106_v40, %v104_v39  ;;  %v108_v46 = vld [vmem:[#allocation8 + $0xe0] sm:$0xff] }
  0x42   :  { %v290_v45 = vpack.c.bf16 %v111_v43, %v109_v42  ;;  %v110_v47 = vld [vmem:[#allocation8 + $0xf0] sm:$0xff]  ;;  %v113_v48 = vld [vmem:[#allocation8 + $0x108] sm:$0xff]  ;;  %v115_v49 = vld [vmem:[#allocation8 + $0x118] sm:$0xff]  ;;  %v67_v35 = vshrl.u32 %v66_v34, 7 }
  0x43   :  { %273 = vmatpush1.bf16.msra.mxu0 %v272_v19  ;;  %v292_v50 = vpack.c.bf16 %v110_v47, %v108_v46  ;;  %v294_v51 = vpack.c.bf16 %v115_v49, %v113_v48  ;;  %v112_v52 = vld [vmem:[#allocation8 + $0x100] sm:$0xff]  ;;  %v114_v53 = vld [vmem:[#allocation8 + $0x110] sm:$0xff]  ;;  %v117_v54 = vld [vmem:[#allocation8 + $0x128] sm:$0xff] }
  0x44   :  { %275 = vmatprep.subr.bf16.mxu0 %v274_v20  ;;  %v119_v55 = vld [vmem:[#allocation8 + $0x138] sm:$0xff]  ;;  %v296_v56 = vpack.c.bf16 %v114_v53, %v112_v52  ;;  %v116_v58 = vld [vmem:[#allocation8 + $0x120] sm:$0xff]  ;;  %v118_v59 = vld [vmem:[#allocation8 + $0x130] sm:$0xff]  ;;  %v68_v36 = vsub.s32 0, %v67_v35 }
  0x45   :  { %v298_v57 = vpack.c.bf16 %v119_v55, %v117_v54  ;;  %v121_v60 = vld [vmem:[#allocation8 + $0x148] sm:$0xff]  ;;  %v123_v61 = vld [vmem:[#allocation8 + $0x158] sm:$0xff]  ;;  %v300_v62 = vpack.c.bf16 %v118_v59, %v116_v58  ;;  %v120_v0 = vld [vmem:[#allocation8 + $0x140] sm:$0xff] }
  0x46   :  { %v302_v63 = vpack.c.bf16 %v123_v61, %v121_v60  ;;  %v122_v1 = vld [vmem:[#allocation8 + $0x150] sm:$0xff]  ;;  %v125_v2 = vld [vmem:[#allocation8 + $0x168] sm:$0xff]  ;;  %v127_v3 = vld [vmem:[#allocation8 + $0x178] sm:$0xff] }
  0x47   :  { %277 = vmatpush1.bf16.msra.mxu0 %v276_v25  ;;  %v304_v4 = vpack.c.bf16 %v122_v1, %v120_v0  ;;  %v306_v5 = vpack.c.bf16 %v127_v3, %v125_v2  ;;  %v124_v6 = vld [vmem:[#allocation8 + $0x160] sm:$0xff]  ;;  %v126_v7 = vld [vmem:[#allocation8 + $0x170] sm:$0xff]  ;;  %v129_v8 = vld [vmem:[#allocation8 + $0x188] sm:$0xff] }
  0x48   :  { %279 = vmatprep.subr.bf16.mxu0 %v278_v26  ;;  %v131_v9 = vld [vmem:[#allocation8 + $0x198] sm:$0xff]  ;;  %v308_v10 = vpack.c.bf16 %v126_v7, %v124_v6  ;;  %v128_v12 = vld [vmem:[#allocation8 + $0x180] sm:$0xff]  ;;  %v130_v13 = vld [vmem:[#allocation8 + $0x190] sm:$0xff] }
  0x49   :  { %v310_v11 = vpack.c.bf16 %v131_v9, %v129_v8  ;;  %v133_v14 = vld [vmem:[#allocation8 + $0x1a8] sm:$0xff]  ;;  %v135_v15 = vld [vmem:[#allocation8 + $0x1b8] sm:$0xff]  ;;  %v312_v16 = vpack.c.bf16 %v130_v13, %v128_v12  ;;  %v132_v18 = vld [vmem:[#allocation8 + $0x1a0] sm:$0xff] }
  0x4a   :  { %v314_v17 = vpack.c.bf16 %v135_v15, %v133_v14  ;;  %v134_v19 = vld [vmem:[#allocation8 + $0x1b0] sm:$0xff]  ;;  %v137_v20 = vld [vmem:[#allocation8 + $0x1c8] sm:$0xff]  ;;  %v139_v21 = vld [vmem:[#allocation8 + $0x1d8] sm:$0xff] }
  0x4b   :  { %281 = vmatpush1.bf16.msra.mxu0 %v280_v31  ;;  %v316_v22 = vpack.c.bf16 %v134_v19, %v132_v18  ;;  %v318_v23 = vpack.c.bf16 %v139_v21, %v137_v20  ;;  %v136_v24 = vld [vmem:[#allocation8 + $0x1c0] sm:$0xff]  ;;  %v138_v25 = vld [vmem:[#allocation8 + $0x1d0] sm:$0xff]  ;;  %v141_v26 = vld [vmem:[#allocation8 + $0x1e8] sm:$0xff] }
  0x4c   :  { %283 = vmatprep.subr.bf16.mxu0 %v282_v32  ;;  %v143_v27 = vld [vmem:[#allocation8 + $0x1f8] sm:$0xff]  ;;  %v320_v28 = vpack.c.bf16 %v138_v25, %v136_v24  ;;  %v140_v30 = vld [vmem:[#allocation8 + $0x1e0] sm:$0xff]  ;;  %v142_v31 = vld [vmem:[#allocation8 + $0x1f0] sm:$0xff] }
  0x4d   :  { %v322_v29 = vpack.c.bf16 %v143_v27, %v141_v26  ;;  %v324_v32 = vpack.c.bf16 %v142_v31, %v140_v30  ;;  %v76_v33 = vld [vmem:[#allocation3] sm:$0xff] }
  0x4f   :  { %285 = vmatpush1.bf16.msra.mxu0 %v284_v37  ;;  %v64_v37 = vld [vmem:[%s558_s3] sm:$0x3] }
  0x50   :  { %287 = vmatprep.subr.bf16.mxu0 %v286_v38  ;;  %v72_v38 = vsub.s32 1, %v67_v35  ;;  %v69_v39 = vrot.slane %v64_v37, %v68_v36 }
  0x52   :  { %v73_v40 = vrot.slane %v64_v37, %v72_v38 }
  0x53   :  { %289 = vmatpush1.bf16.msra.mxu0 %v288_v44 }
  0x54   :  { %291 = vmatprep.subr.bf16.mxu0 %v290_v45 }
  0x57   :  { %293 = vmatpush1.bf16.msra.mxu0 %v292_v50 }
  0x58   :  { %295 = vmatprep.subr.bf16.mxu0 %v294_v51 }
  0x5b   :  { %297 = vmatpush1.bf16.msra.mxu0 %v296_v56 }
  0x5c   :  { %299 = vmatprep.subr.bf16.mxu0 %v298_v57 }
  0x5f   :  { %301 = vmatpush1.bf16.msra.mxu0 %v300_v62 }
  0x60   :  { %303 = vmatprep.subr.bf16.mxu0 %v302_v63 }
  0x63   :  { %305 = vmatpush1.bf16.msra.mxu0 %v304_v4 }
  0x64   :  { %307 = vmatprep.subr.bf16.mxu0 %v306_v5 }
  0x67   :  { %309 = vmatpush1.bf16.msra.mxu0 %v308_v10 }
  0x68   :  { %311 = vmatprep.subr.bf16.mxu0 %v310_v11 }
  0x6b   :  { %313 = vmatpush1.bf16.msra.mxu0 %v312_v16 }
  0x6c   :  { %315 = vmatprep.subr.bf16.mxu0 %v314_v17 }
  0x6f   :  { %317 = vmatpush1.bf16.msra.mxu0 %v316_v22 }
  0x70   :  { %319 = vmatprep.subr.bf16.mxu0 %v318_v23 }
  0x73   :  { %321 = vmatpush1.bf16.msra.mxu0 %v320_v28 }
  0x74   :  { %323 = vmatprep.subr.bf16.mxu0 %v322_v29 }
  0x77   :  { %325 = vmatpush1.bf16.msra.mxu0 %v324_v32 }
  0x7a   :  { %209 = vmatmul.mubr.f32.vlgmr.msra.gmra.mrb[0].mxu0 %v76_v33 }
 0x14d   :  { %v210_v41 = vpop.f32.mrb[0].mxu0 }
 0x14e   :  { %v211_v42 = vadd.f32 %v210_v41, %v69_v39  ;;  %v212_v43 = vpop.f32.mrb[1].mxu0 }
 0x14f   :  { %v213_v44 = vadd.f32 %v212_v43, %v73_v40 }
 0x150   :  { %231 = vst [vmem:[#allocation10] sm:$0xff] %v211_v42 }
 0x151   :  { %215 = vmax.xlane.f32.xlu0 %v213_v44 }
 0x1de   :  { %v216_v45 = vpop.xlane.xlu0 %215 }
 0x1df   :  { %v217_v46 = vsub.f32 %v213_v44, %v216_v45 }
 0x1e1   :  { %v218_v47 = vmul.f32 1.442695, %v217_v46 }
 0x1e3   :  { %333 = vpow2.f32 %v218_v47 }
 0x1ed   :  { %v334_v48 = vpop.eup %333 }
 0x1ee   :  { %220 = vadd.xlane.f32.xlu0 %v334_v48 }
 0x1ef   :  { %414 = shalt.err (!%p411_p0)
}
 0x1f0   :  { %s415_s9 = scalar_lea.hbm %s560_s5, 128 }
 0x1f1   :  { %p416_p1 = scmp.ne.s32.totalorder %s560_s5, %s415_s9  ;;  %p419_p2 = scmp.lt.u32.totalorder %s415_s9, %s560_s5 }
 0x1f3   :  { %p421_p3 = pnand %p419_p2, %p416_p1 }
 0x1f5   :  { %424 = shalt.err (!%p421_p3)
}
 0x1f6   :  { %251 = dma.vmem_to_hbm [thread:$0]  %s249_s6, 128, %s560_s5, [#allocation11]  }
 0x1f7   :  { %s461_s15 = smov [#allocation9]  }
 0x1f8   :  { %s238_s16 = sshll.u32 %s461_s15, 4  ;;  %s239_s16 = int_to_ptr.vmem [resolvable:$true] %s238_s16 }
 0x1f9   :  { %s425_s17 = scalar_lea.vmem %s239_s16, 128  ;;  %p430_p5 = scmp.lt.s32.totalorder %s239_s16, %s239_s16 }
 0x1fa   :  { %p426_p4 = scmp.ne.s32.totalorder %s239_s16, %s425_s17  ;;  %p431_p6 = scmp.lt.s32.totalorder %s425_s17, %s425_s17 }
 0x1fc   :  { %p432_p7 = por %p431_p6, %p430_p5 }
 0x1fe   :  { %p433_p8 = pnand %p432_p7, %p426_p4 }
 0x27b   :  { %v221_v49 = vpop.xlane.xlu0 %220 }
 0x27c   :  { %335 = vlog2.f32 %v221_v49 }
 0x286   :  { %v336_v50 = vpop.eup %335 }
 0x287   :  { %v223_v51 = vmul.f32 0.6931472, %v336_v50 }
 0x289   :  { %v224_v52 = vsub.f32 %v217_v46, %v223_v51 }
 0x28b   :  { %225 = vst [vmem:[#allocation9] sm:$0xff] %v224_v52 }
 0x28c   :  { %436 = shalt.err (!%p433_p8)
}
 0x28d   :  { %s437_s5 = scalar_lea.hbm %s559_s4, 128 }
 0x28e   :  { %p438_p9 = scmp.ne.s32.totalorder %s559_s4, %s437_s5  ;;  %p441_p10 = scmp.lt.u32.totalorder %s437_s5, %s559_s4 }
 0x290   :  { %p443_p11 = pnand %p441_p10, %p438_p9 }
 0x292   :  { %446 = shalt.err (!%p443_p11)
}
 0x293   :  { %241 = dma.vmem_to_hbm [thread:$0]  %s239_s16, 128, %s559_s4, [#allocation5]  }
 0x294   :  { %451 = dma.done.wait [#allocation5], 128  }
 0x295   :  { %452 = vsyncadd [#allocation5], 4294967168 }
 0x296   :  { %453 = dma.done.wait [#allocation11], 128  }
 0x297   :  { %454 = vsyncadd [#allocation11], 4294967168 }
 0x298   :  { %258 = vsyncpa [#allocation4], 1 }
 0x299   :  { %259 = vsyncpa [#allocation7], 1 }
 0x29a   :  { %260 = vsyncpa [#allocation5], 1 }
 0x29b   :  { %261 = vsyncpa [#allocation11], 1 }

</bundles_post_ra>
